<compile_context>
chip_gen: v7x
topology: tpu7x:2x2x1
jax: 0.10.0
libtpu: 0.0.40
codegen_flags: <defaults>
</compile_context>

<pallas_src>
import jax
import jax.numpy as jnp
from jax.experimental import pallas as pl
from jax.experimental.pallas import tpu as pltpu


def mlp_kernel(x_ref,
               w0_ref, b0_ref,
               w1_ref, b1_ref,
               w2_ref, b2_ref,
               w3_ref, b3_ref,
               w4_ref, b4_ref,
               w5_ref, b5_ref,
               o_ref):
    # Activations are (features, TILE_B): batch on lanes, features on sublanes.
    x = x_ref[...]                                        # (1, T) f32

    # Layer 0: contraction dim K=1 -> VPU broadcast outer product, not the MXU.
    h = w0_ref[...] * x + b0_ref[...]                     # (16,1)*(1,T)+(16,1) -> (16,T)
    h = jnp.maximum(h, 0.0)

    # Layers 1..4: (out,in) @ (in,T) on the MXU, bf16 inputs / f32 accumulate.
    for w_ref, b_ref in ((w1_ref, b1_ref), (w2_ref, b2_ref),
                         (w3_ref, b3_ref), (w4_ref, b4_ref)):
        h = jnp.dot(w_ref[...].astype(jnp.bfloat16),
                    h.astype(jnp.bfloat16),
                    preferred_element_type=jnp.float32) + b_ref[...]
        h = jnp.maximum(h, 0.0)

    # Layer 5: output dim = 1 -> multiply + sublane reduction (VPU/XLU), not the MXU.
    out = jnp.sum(w5_ref[...] * h, axis=0, keepdims=True) + b5_ref[...]   # (1, T)
    o_ref[...] = out.astype(o_ref.dtype)


def value_function_forward(x, params, *, tile_b=512):
    """x: (B, 1) float32.  params: kernel-layout list from init_params()."""
    B = x.shape[0]
    num_tiles = pl.cdiv(B, tile_b)
    Bp = num_tiles * tile_b

    # Batch-on-lanes layout: (1, Bp), zero-padded to a whole number of tiles.
    xt = jnp.zeros((1, Bp), jnp.float32).at[0, :B].set(x[:, 0])

    flat_args = [xt]
    in_specs = [pl.BlockSpec((1, tile_b), lambda i: (0, i))]
    for (w, b) in params:
        flat_args += [w, b]
        # Constant block index -> weights/biases DMA'd once, VMEM-resident.
        in_specs += [pl.BlockSpec(w.shape, lambda i: (0, 0)),
                     pl.BlockSpec(b.shape, lambda i: (0, 0))]

    out = pl.pallas_call(
        mlp_kernel,
        grid=(num_tiles,),
        in_specs=in_specs,
        out_specs=pl.BlockSpec((1, tile_b), lambda i: (0, i)),
        out_shape=jax.ShapeDtypeStruct((1, Bp), jnp.float32),
        compiler_params=pltpu.CompilerParams(
            dimension_semantics=("parallel",)),
    )(*flat_args)

    return out[0, :B][:, None]                            # back to (B, 1)


def init_params(key):
    """nn.Linear default init U(-1/sqrt(fan_in), +1/sqrt(fan_in)).

    Kernel layout:
      layer 0 weight: (out=16, in=1)  PyTorch layout, used as a broadcast column
      layers 1-4    : (out, in)       PyTorch layout, used as the MXU LHS
      layer 5 weight: (in=64, 1)      pre-transposed column for the lane-wise reduce
      biases        : (out, 1)        columns broadcasting over the batch lanes
    """
    layer_dims = [(1, 16), (16, 32), (32, 64), (64, 64), (64, 64), (64, 1)]
    params = []
    for li, (fan_in, fan_out) in enumerate(layer_dims):
        key, kw, kb = jax.random.split(key, 3)
        bound = 1.0 / float(fan_in) ** 0.5
        w = jax.random.uniform(kw, (fan_out, fan_in), jnp.float32,
                               minval=-bound, maxval=bound)
        b = jax.random.uniform(kb, (fan_out, 1), jnp.float32,
                               minval=-bound, maxval=bound)
        if li == len(layer_dims) - 1:
            w = w.T                                       # (64, 1) column
        params.append((w, b))
    return params


def reference_forward(x, params, bf16_matmuls=False):
    """Plain-JAX reference in the standard (B, F) layout."""
    (w0, b0), (w1, b1), (w2, b2), (w3, b3), (w4, b4), (w5, b5) = params
    h = jnp.maximum(x @ w0.T + b0.T, 0.0)
    for w, b in ((w1, b1), (w2, b2), (w3, b3), (w4, b4)):
        if bf16_matmuls:
            h = jnp.dot(h.astype(jnp.bfloat16), w.T.astype(jnp.bfloat16),
                        preferred_element_type=jnp.float32) + b.T
        else:
            h = h @ w.T + b.T
        h = jnp.maximum(h, 0.0)
    return h @ w5 + b5.T


if __name__ == "__main__":
    key = jax.random.PRNGKey(0)
    key, kx = jax.random.split(key)
    params = init_params(key)

    B = 1000          # not a multiple of the tile -> exercises the padding path
    TILE_B = 256      # multiple of 256 (v6e/v7x MXU fill) and of 128 (v5e)
    x = jax.random.normal(kx, (B, 1), jnp.float32)

    out = jax.block_until_ready(value_function_forward(x, params, tile_b=TILE_B))
    assert out.shape == (B, 1)

    # Tight check against a bf16-matmul-emulating reference (same arithmetic as
    # the kernel), loose sanity check against the pure f32 reference.
    ref_bf16 = reference_forward(x, params, bf16_matmuls=True)
    ref_f32 = reference_forward(x, params, bf16_matmuls=False)
    assert jnp.allclose(out, ref_bf16, atol=1e-3, rtol=1e-2), \
        float(jnp.max(jnp.abs(out - ref_bf16)))
    assert jnp.allclose(out, ref_f32, atol=5e-2, rtol=5e-2), \
        float(jnp.max(jnp.abs(out - ref_f32)))

    print("KERNEL_OK")
</pallas_src>

<mosaic_0001>
module attributes {stable_mosaic.version = 11 : i64} {
  func.func @mlp_kernel(%arg0: i32, %arg1: memref<1x256xf32, #tpu.memory_space<vmem>>, %arg2: memref<16x1xf32, #tpu.memory_space<vmem>>, %arg3: memref<16x1xf32, #tpu.memory_space<vmem>>, %arg4: memref<32x16xf32, #tpu.memory_space<vmem>>, %arg5: memref<32x1xf32, #tpu.memory_space<vmem>>, %arg6: memref<64x32xf32, #tpu.memory_space<vmem>>, %arg7: memref<64x1xf32, #tpu.memory_space<vmem>>, %arg8: memref<64x64xf32, #tpu.memory_space<vmem>>, %arg9: memref<64x1xf32, #tpu.memory_space<vmem>>, %arg10: memref<64x64xf32, #tpu.memory_space<vmem>>, %arg11: memref<64x1xf32, #tpu.memory_space<vmem>>, %arg12: memref<64x1xf32, #tpu.memory_space<vmem>>, %arg13: memref<1x1xf32, #tpu.memory_space<vmem>>, %arg14: memref<1x256xf32, #tpu.memory_space<vmem>>) attributes {dimension_semantics = [#tpu.dimension_semantics<parallel>], iteration_bounds = array<i64: 4>, scalar_prefetch = 0 : i64, scratch_operands = 0 : i64, tpu.core_type = #tpu.core_type<tc>, window_params = [{transform_indices = @transform_0, window_bounds = array<i64: 1, 256>}, {pipeline_mode = #tpu.pipeline_mode<synchronous>, transform_indices = @transform_1, window_bounds = array<i64: 16, 1>}, {pipeline_mode = #tpu.pipeline_mode<synchronous>, transform_indices = @transform_2, window_bounds = array<i64: 16, 1>}, {pipeline_mode = #tpu.pipeline_mode<synchronous>, transform_indices = @transform_3, window_bounds = array<i64: 32, 16>}, {pipeline_mode = #tpu.pipeline_mode<synchronous>, transform_indices = @transform_4, window_bounds = array<i64: 32, 1>}, {pipeline_mode = #tpu.pipeline_mode<synchronous>, transform_indices = @transform_5, window_bounds = array<i64: 64, 32>}, {pipeline_mode = #tpu.pipeline_mode<synchronous>, transform_indices = @transform_6, window_bounds = array<i64: 64, 1>}, {pipeline_mode = #tpu.pipeline_mode<synchronous>, transform_indices = @transform_7, window_bounds = array<i64: 64, 64>}, {pipeline_mode = #tpu.pipeline_mode<synchronous>, transform_indices = @transform_8, window_bounds = array<i64: 64, 1>}, {pipeline_mode = #tpu.pipeline_mode<synchronous>, transform_indices = @transform_9, window_bounds = array<i64: 64, 64>}, {pipeline_mode = #tpu.pipeline_mode<synchronous>, transform_indices = @transform_10, window_bounds = array<i64: 64, 1>}, {pipeline_mode = #tpu.pipeline_mode<synchronous>, transform_indices = @transform_11, window_bounds = array<i64: 64, 1>}, {pipeline_mode = #tpu.pipeline_mode<synchronous>, transform_indices = @transform_12, window_bounds = array<i64: 1, 1>}, {transform_indices = @transform_13, window_bounds = array<i64: 1, 256>}]} {
    %c0 = arith.constant 0 : index
    %c0_0 = arith.constant 0 : index
    %0 = vector.load %arg1[%c0, %c0_0] : memref<1x256xf32, #tpu.memory_space<vmem>>, vector<1x256xf32>
    %c0_1 = arith.constant 0 : index
    %c0_2 = arith.constant 0 : index
    %1 = vector.load %arg2[%c0_1, %c0_2] : memref<16x1xf32, #tpu.memory_space<vmem>>, vector<16x1xf32>
    %2 = vector.broadcast %1 : vector<16x1xf32> to vector<16x256xf32>
    %3 = vector.broadcast %0 : vector<1x256xf32> to vector<16x256xf32>
    %4 = arith.mulf %2, %3 : vector<16x256xf32>
    %c0_3 = arith.constant 0 : index
    %c0_4 = arith.constant 0 : index
    %5 = vector.load %arg3[%c0_3, %c0_4] : memref<16x1xf32, #tpu.memory_space<vmem>>, vector<16x1xf32>
    %6 = vector.broadcast %5 : vector<16x1xf32> to vector<16x256xf32>
    %7 = arith.addf %4, %6 : vector<16x256xf32>
    %cst = arith.constant 0.000000e+00 : f32
    %8 = vector.broadcast %cst : f32 to vector<16x256xf32>
    %9 = arith.maximumf %7, %8 : vector<16x256xf32>
    %c0_5 = arith.constant 0 : index
    %c0_6 = arith.constant 0 : index
    %10 = vector.load %arg4[%c0_5, %c0_6] : memref<32x16xf32, #tpu.memory_space<vmem>>, vector<32x16xf32>
    %11 = arith.truncf %10 : vector<32x16xf32> to vector<32x16xbf16>
    %12 = arith.truncf %9 : vector<16x256xf32> to vector<16x256xbf16>
    %cst_7 = arith.constant dense<0.000000e+00> : vector<32x256xf32>
    %13 = tpu.matmul %11, %12, %cst_7 {dimension_numbers = #tpu.dot_dimension_numbers<[1], [0], [0], [1], [0, 0, 1, 1], [], []>} : vector<32x16xbf16>, vector<16x256xbf16>, vector<32x256xf32> -> vector<32x256xf32>
    %c0_8 = arith.constant 0 : index
    %c0_9 = arith.constant 0 : index
    %14 = vector.load %arg5[%c0_8, %c0_9] : memref<32x1xf32, #tpu.memory_space<vmem>>, vector<32x1xf32>
    %15 = vector.broadcast %14 : vector<32x1xf32> to vector<32x256xf32>
    %16 = arith.addf %13, %15 : vector<32x256xf32>
    %cst_10 = arith.constant 0.000000e+00 : f32
    %17 = vector.broadcast %cst_10 : f32 to vector<32x256xf32>
    %18 = arith.maximumf %16, %17 : vector<32x256xf32>
    %c0_11 = arith.constant 0 : index
    %c0_12 = arith.constant 0 : index
    %19 = vector.load %arg6[%c0_11, %c0_12] : memref<64x32xf32, #tpu.memory_space<vmem>>, vector<64x32xf32>
    %20 = arith.truncf %19 : vector<64x32xf32> to vector<64x32xbf16>
    %21 = arith.truncf %18 : vector<32x256xf32> to vector<32x256xbf16>
    %cst_13 = arith.constant dense<0.000000e+00> : vector<64x256xf32>
    %22 = tpu.matmul %20, %21, %cst_13 {dimension_numbers = #tpu.dot_dimension_numbers<[1], [0], [0], [1], [0, 0, 1, 1], [], []>} : vector<64x32xbf16>, vector<32x256xbf16>, vector<64x256xf32> -> vector<64x256xf32>
    %c0_14 = arith.constant 0 : index
    %c0_15 = arith.constant 0 : index
    %23 = vector.load %arg7[%c0_14, %c0_15] : memref<64x1xf32, #tpu.memory_space<vmem>>, vector<64x1xf32>
    %24 = vector.broadcast %23 : vector<64x1xf32> to vector<64x256xf32>
    %25 = arith.addf %22, %24 : vector<64x256xf32>
    %cst_16 = arith.constant 0.000000e+00 : f32
    %26 = vector.broadcast %cst_16 : f32 to vector<64x256xf32>
    %27 = arith.maximumf %25, %26 : vector<64x256xf32>
    %c0_17 = arith.constant 0 : index
    %c0_18 = arith.constant 0 : index
    %28 = vector.load %arg8[%c0_17, %c0_18] : memref<64x64xf32, #tpu.memory_space<vmem>>, vector<64x64xf32>
    %29 = arith.truncf %28 : vector<64x64xf32> to vector<64x64xbf16>
    %30 = arith.truncf %27 : vector<64x256xf32> to vector<64x256xbf16>
    %cst_19 = arith.constant dense<0.000000e+00> : vector<64x256xf32>
    %31 = tpu.matmul %29, %30, %cst_19 {dimension_numbers = #tpu.dot_dimension_numbers<[1], [0], [0], [1], [0, 0, 1, 1], [], []>} : vector<64x64xbf16>, vector<64x256xbf16>, vector<64x256xf32> -> vector<64x256xf32>
    %c0_20 = arith.constant 0 : index
    %c0_21 = arith.constant 0 : index
    %32 = vector.load %arg9[%c0_20, %c0_21] : memref<64x1xf32, #tpu.memory_space<vmem>>, vector<64x1xf32>
    %33 = vector.broadcast %32 : vector<64x1xf32> to vector<64x256xf32>
    %34 = arith.addf %31, %33 : vector<64x256xf32>
    %cst_22 = arith.constant 0.000000e+00 : f32
    %35 = vector.broadcast %cst_22 : f32 to vector<64x256xf32>
    %36 = arith.maximumf %34, %35 : vector<64x256xf32>
    %c0_23 = arith.constant 0 : index
    %c0_24 = arith.constant 0 : index
    %37 = vector.load %arg10[%c0_23, %c0_24] : memref<64x64xf32, #tpu.memory_space<vmem>>, vector<64x64xf32>
    %38 = arith.truncf %37 : vector<64x64xf32> to vector<64x64xbf16>
    %39 = arith.truncf %36 : vector<64x256xf32> to vector<64x256xbf16>
    %cst_25 = arith.constant dense<0.000000e+00> : vector<64x256xf32>
    %40 = tpu.matmul %38, %39, %cst_25 {dimension_numbers = #tpu.dot_dimension_numbers<[1], [0], [0], [1], [0, 0, 1, 1], [], []>} : vector<64x64xbf16>, vector<64x256xbf16>, vector<64x256xf32> -> vector<64x256xf32>
    %c0_26 = arith.constant 0 : index
    %c0_27 = arith.constant 0 : index
    %41 = vector.load %arg11[%c0_26, %c0_27] : memref<64x1xf32, #tpu.memory_space<vmem>>, vector<64x1xf32>
    %42 = vector.broadcast %41 : vector<64x1xf32> to vector<64x256xf32>
    %43 = arith.addf %40, %42 : vector<64x256xf32>
    %cst_28 = arith.constant 0.000000e+00 : f32
    %44 = vector.broadcast %cst_28 : f32 to vector<64x256xf32>
    %45 = arith.maximumf %43, %44 : vector<64x256xf32>
    %c0_29 = arith.constant 0 : index
    %c0_30 = arith.constant 0 : index
    %46 = vector.load %arg12[%c0_29, %c0_30] : memref<64x1xf32, #tpu.memory_space<vmem>>, vector<64x1xf32>
    %47 = vector.broadcast %46 : vector<64x1xf32> to vector<64x256xf32>
    %48 = arith.mulf %47, %45 : vector<64x256xf32>
    %cst_31 = arith.constant dense<0.000000e+00> : vector<256xf32>
    %49 = vector.multi_reduction <add>, %48, %cst_31 [0] : vector<64x256xf32> to vector<256xf32>
    %50 = vector.shape_cast %49 : vector<256xf32> to vector<1x256xf32>
    %c0_32 = arith.constant 0 : index
    %c0_33 = arith.constant 0 : index
    %51 = vector.load %arg13[%c0_32, %c0_33] : memref<1x1xf32, #tpu.memory_space<vmem>>, vector<1x1xf32>
    %52 = vector.broadcast %51 : vector<1x1xf32> to vector<1x256xf32>
    %53 = arith.addf %50, %52 : vector<1x256xf32>
    %c0_34 = arith.constant 0 : index
    %c0_35 = arith.constant 0 : index
    %54 = vector.load %arg14[%c0_34, %c0_35] : memref<1x256xf32, #tpu.memory_space<vmem>>, vector<1x256xf32>
    tpu.vector_store %arg14[%c0_34, %c0_35], %53 {strides = array<i32>} : memref<1x256xf32, #tpu.memory_space<vmem>>, vector<1x256xf32>,
    return
  }
  func.func @transform_0(%arg0: i32) -> (i32, i32) {
    %c0_i32 = arith.constant 0 : i32
    %c0_i32_0 = arith.constant 0 : i32
    return %c0_i32, %arg0 : i32, i32
  }
  func.func @transform_1(%arg0: i32) -> (i32, i32) {
    %c0_i32 = arith.constant 0 : i32
    %c0_i32_0 = arith.constant 0 : i32
    %c0_i32_1 = arith.constant 0 : i32
    return %c0_i32, %c0_i32_0 : i32, i32
  }
  func.func @transform_2(%arg0: i32) -> (i32, i32) {
    %c0_i32 = arith.constant 0 : i32
    %c0_i32_0 = arith.constant 0 : i32
    %c0_i32_1 = arith.constant 0 : i32
    return %c0_i32, %c0_i32_0 : i32, i32
  }
  func.func @transform_3(%arg0: i32) -> (i32, i32) {
    %c0_i32 = arith.constant 0 : i32
    %c0_i32_0 = arith.constant 0 : i32
    %c0_i32_1 = arith.constant 0 : i32
    return %c0_i32, %c0_i32_0 : i32, i32
  }
  func.func @transform_4(%arg0: i32) -> (i32, i32) {
    %c0_i32 = arith.constant 0 : i32
    %c0_i32_0 = arith.constant 0 : i32
    %c0_i32_1 = arith.constant 0 : i32
    return %c0_i32, %c0_i32_0 : i32, i32
  }
  func.func @transform_5(%arg0: i32) -> (i32, i32) {
    %c0_i32 = arith.constant 0 : i32
    %c0_i32_0 = arith.constant 0 : i32
    %c0_i32_1 = arith.constant 0 : i32
    return %c0_i32, %c0_i32_0 : i32, i32
  }
  func.func @transform_6(%arg0: i32) -> (i32, i32) {
    %c0_i32 = arith.constant 0 : i32
    %c0_i32_0 = arith.constant 0 : i32
    %c0_i32_1 = arith.constant 0 : i32
    return %c0_i32, %c0_i32_0 : i32, i32
  }
  func.func @transform_7(%arg0: i32) -> (i32, i32) {
    %c0_i32 = arith.constant 0 : i32
    %c0_i32_0 = arith.constant 0 : i32
    %c0_i32_1 = arith.constant 0 : i32
    return %c0_i32, %c0_i32_0 : i32, i32
  }
  func.func @transform_8(%arg0: i32) -> (i32, i32) {
    %c0_i32 = arith.constant 0 : i32
    %c0_i32_0 = arith.constant 0 : i32
    %c0_i32_1 = arith.constant 0 : i32
    return %c0_i32, %c0_i32_0 : i32, i32
  }
  func.func @transform_9(%arg0: i32) -> (i32, i32) {
    %c0_i32 = arith.constant 0 : i32
    %c0_i32_0 = arith.constant 0 : i32
    %c0_i32_1 = arith.constant 0 : i32
    return %c0_i32, %c0_i32_0 : i32, i32
  }
  func.func @transform_10(%arg0: i32) -> (i32, i32) {
    %c0_i32 = arith.constant 0 : i32
    %c0_i32_0 = arith.constant 0 : i32
    %c0_i32_1 = arith.constant 0 : i32
    return %c0_i32, %c0_i32_0 : i32, i32
  }
  func.func @transform_11(%arg0: i32) -> (i32, i32) {
    %c0_i32 = arith.constant 0 : i32
    %c0_i32_0 = arith.constant 0 : i32
    %c0_i32_1 = arith.constant 0 : i32
    return %c0_i32, %c0_i32_0 : i32, i32
  }
  func.func @transform_12(%arg0: i32) -> (i32, i32) {
    %c0_i32 = arith.constant 0 : i32
    %c0_i32_0 = arith.constant 0 : i32
    %c0_i32_1 = arith.constant 0 : i32
    return %c0_i32, %c0_i32_0 : i32, i32
  }
  func.func @transform_13(%arg0: i32) -> (i32, i32) {
    %c0_i32 = arith.constant 0 : i32
    %c0_i32_0 = arith.constant 0 : i32
    return %c0_i32, %arg0 : i32, i32
  }
}

</mosaic_0001>

<bundles_post_ra>
// kernel: tpu_custom_call.1
= control target key start
LH: loop header
LB: loop body
LE: loop exit
PB: predicated region body
PF: predicated region fallthrough
CT: control target
= control target key end

     0   :  { %s1850_s0 = inlined_call_operand.vmem [shape: f32[1,1024], index: 0, kind: input, shape index: {}]   ;;  %s1851_s1 = inlined_call_operand.vmem [shape: f32[16,1], index: 1, kind: input, shape index: {}]   ;;  %s1852_s2 = inlined_call_operand.vmem [shape: f32[16,1], index: 2, kind: input, shape index: {}]   ;;  %s1853_s3 = inlined_call_operand.vmem [shape: f32[32,16], index: 3, kind: input, shape index: {}]   ;;  %s1854_s4 = inlined_call_operand.vmem [shape: f32[32,1], index: 4, kind: input, shape index: {}]   ;;  %s1855_s5 = inlined_call_operand.vmem [shape: f32[64,32], index: 5, kind: input, shape index: {}]   ;;  %s1856_s6 = inlined_call_operand.vmem [shape: f32[64,1], index: 6, kind: input, shape index: {}]   ;;  %s1857_s7 = inlined_call_operand.vmem [shape: f32[64,64], index: 7, kind: input, shape index: {}]   ;;  %s1858_s8 = inlined_call_operand.vmem [shape: f32[64,1], index: 8, kind: input, shape index: {}]   ;;  %s1859_s9 = inlined_call_operand.vmem [shape: f32[64,64], index: 9, kind: input, shape index: {}]   ;;  %s1860_s10 = inlined_call_operand.vmem [shape: f32[64,1], index: 10, kind: input, shape index: {}]   ;;  %s1861_s11 = inlined_call_operand.vmem [shape: f32[64,1], index: 11, kind: input, shape index: {}]   ;;  %s1862_s12 = inlined_call_operand.<no memory space> [shape: f32[1,1], index: 12, kind: input, shape index: {}]   ;;  %s1863_s13 = inlined_call_operand.hbm [shape: f32[1,1024], index: 13, kind: output, shape index: {}]  }
   0x1   :  { %1864 = sst [smem:[#allocation6_spill]] %s1850_s0  ;;  %v18_v0 = vstv %s1862_s12 }
   0x2   :  { %1865 = sst [smem:[#allocation7_spill]] %s1851_s1  ;;  %19 = vst [vmem:[#allocation2] sm:$0x1] %v18_v0 }
   0x3   :  { %20 = vsyncpa [#allocation4], 0 }
   0x4   :  { %22 = vsyncpa [#allocation4 + $0x1], 0  ;;  %s1508_s27 = smov 0   ;;  %s1510_s28 = smov 0  }
   0x5   :  { %s1512_s29 = smov 0   ;;  %s1514_s30 = smov 0  }
   0x6 LB: > { %s1529_s12 = sadd.s32 4294967295, %s1430_s30   ;;  %s1291_s14 = sadd.s32 4294967294, %s1430_s30   ;;  %s1430_s30 = sphi %s1514_s30, %s1873_s30   ;;  %s1426_s29 = sphi %s1512_s29, %s1872_s29   ;;  %s1422_s28 = sphi %s1510_s28, %s1871_s28   ;;  %s1418_s27 = sphi %s1508_s27, %s1870_s27  }
   0x7   : > { %s1533_s15 = sadd.s32 1, %s1430_s30   ;;  %s313_s16 = sadd.s32 1, %s1426_s29 }
   0x8   : > { %s310_s17 = ssub.s32 %s1430_s30, %s1533_s15  ;;  %p323_p0 = scmp.ne.s32.totalorder %s1426_s29, %s1422_s28 }
   0x9   : > { %p311_p1 = scmp.eq.s32.totalorder %s310_s17, 0  ;;  %p324_p2 = scmp.eq.s32.totalorder %s1529_s12, 3 }
   0xa   : > { %p329_p3 = scmp.ne.s32.totalorder %s1422_s28, %s1418_s27  ;;  %p330_p4 = scmp.eq.s32.totalorder %s1291_s14, 3 }
   0xb   : > { %s1544_s18 = scalar_select %p311_p1, %s1426_s29, %s313_s16  }
   0xc   : > { %p1546_p5 = por %p324_p2, %p323_p0  ;;  %p1550_p6 = por %p330_p4, %p329_p3 }
   0xd   : > { %p1294_p7 = scmp.ge.s32.totalorder %s1430_s30, 1  ;;  %p392_p8 = scmp.lt.s32.totalorder %s1430_s30, 5 }
   0xf   : > { %p393_p9 = pnand %p1294_p7, %p392_p8 }
  0x10   : > { %v470_v1 = vld [vmem:[%s1852_s2] sm:$0xff] (!%p393_p9)  ;;  %s1868_s1 = sld [smem:[#allocation7_spill]] (!%p393_p9)  ;;  %v1432_v3 = vmov (!%p393_p9), 0   ;;  %v471_v4 = vld [vmem:[%s1852_s2 + $0x8] sm:$0xff] (!%p393_p9)  ;;  %v501_v8 = vld [vmem:[%s1854_s4 + $0x18] sm:$0xff] (!%p393_p9)  ;;  %s1296_s22 = sshll.u32 (!%p393_p9), %s1529_s12, 1  ;;  %v456_v43 = vlaneseq (!%p393_p9) }
  0x11   : > { %396 = sbr.rel (%p393_p9) target bundleno = 1171 (0x493), region = 72  ;;  %1367 = vset.pattern.permute.xlu1 (!%p393_p9), %v1432_v3  ;;  %1366 = vset.pattern.permute.xlu0 (!%p393_p9), %v1432_v3  ;;  %v499_v6 = vld [vmem:[%s1854_s4 + $0x8] sm:$0xff] (!%p393_p9)  ;;  %v498_v7 = vld [vmem:[%s1854_s4] sm:$0xff] (!%p393_p9)  ;;  %v500_v9 = vld [vmem:[%s1854_s4 + $0x10] sm:$0xff] (!%p393_p9)  ;;  %p436_p10 = scmp.lt.s32.totalorder (!%p393_p9), %s1296_s22, 7  ;;  %vm522_vm0 = vcmask (!%p393_p9), 130048  }
  0x12   : > { %474 = vperm.xlu1 (!%p393_p9), %1367, %v470_v1   ;;  %561 = vmatprep.mubr.bf16.mxu0 (!%p393_p9), %v1432_v3  ;;  %v607_v10 = vld [vmem:[%s1856_s6 + $0x8] sm:$0xff] (!%p393_p9)  ;;  %v606_v11 = vld [vmem:[%s1856_s6] sm:$0xff] (!%p393_p9)  ;;  %v609_v12 = vld [vmem:[%s1856_s6 + $0x18] sm:$0xff] (!%p393_p9)  ;;  %v1682_v44 = vshrl.u32 (!%p393_p9), %v456_v43, 7  ;;  %s1869_s0 = sld [smem:[#allocation6_spill]] (!%p393_p9)  ;;  %vm654_vm1 = vcmask (!%p393_p9), 261120  }
  0x13   : > { %699 = vmatprep.mubr.bf16.mxu1 (!%p393_p9), %v1432_v3  ;;  %v608_v13 = vld [vmem:[%s1856_s6 + $0x10] sm:$0xff] (!%p393_p9)  ;;  %v611_v14 = vld [vmem:[%s1856_s6 + $0x28] sm:$0xff] (!%p393_p9)  ;;  %v610_v15 = vld [vmem:[%s1856_s6 + $0x20] sm:$0xff] (!%p393_p9)  ;;  %vm824_vm2 = vcmask (!%p393_p9), 523264   ;;  %s1316_s24 = sshll.u32 (!%p393_p9), %s1529_s12, 5  ;;  %vm1217_vm3 = vcmp.lt.s32.totalorder (!%p393_p9), %v456_v43, 256 }
  0x14   : > { %v613_v16 = vld [vmem:[%s1856_s6 + $0x38] sm:$0xff] (!%p393_p9)  ;;  %v612_v17 = vld [vmem:[%s1856_s6 + $0x30] sm:$0xff] (!%p393_p9)  ;;  %v777_v18 = vld [vmem:[%s1858_s8 + $0x8] sm:$0xff] (!%p393_p9)  ;;  %v458_v45 = vsub.s32 (!%p393_p9), 0, %v1682_v44  ;;  %v462_v46 = vsub.s32 (!%p393_p9), 1, %v1682_v44  ;;  %s1808_s16 = scalar_lea.hbm (!%p393_p9), %s1863_s13, %s1316_s24  ;;  %s1434_s12 = smov (!%p393_p9), [#allocation3]  }
  0x15   : > { %v776_v19 = vld [vmem:[%s1858_s8] sm:$0xff] (!%p393_p9)  ;;  %v779_v20 = vld [vmem:[%s1858_s8 + $0x18] sm:$0xff] (!%p393_p9)  ;;  %v778_v21 = vld [vmem:[%s1858_s8 + $0x10] sm:$0xff] (!%p393_p9) }
  0x16   : > { %v443_v2 = vld [vmem:[%s1868_s1] sm:$0xff] (!%p393_p9)  ;;  %v444_v5 = vld [vmem:[%s1868_s1 + $0x8] sm:$0xff] (!%p393_p9)  ;;  %479 = vperm.xlu1 (!%p393_p9), %1367, %v471_v4   ;;  %v783_v24 = vld [vmem:[%s1858_s8 + $0x38] sm:$0xff] (!%p393_p9) }
  0x17   : > { %447 = vperm.xlu0 (!%p393_p9), %1366, %v443_v2   ;;  %v781_v22 = vld [vmem:[%s1858_s8 + $0x28] sm:$0xff] (!%p393_p9)  ;;  %v780_v23 = vld [vmem:[%s1858_s8 + $0x20] sm:$0xff] (!%p393_p9)  ;;  %v782_v25 = vld [vmem:[%s1858_s8 + $0x30] sm:$0xff] (!%p393_p9) }
  0x18   : > { %v947_v26 = vld [vmem:[%s1860_s10 + $0x8] sm:$0xff]  ;;  %v946_v27 = vld [vmem:[%s1860_s10] sm:$0xff]  ;;  %v949_v28 = vld [vmem:[%s1860_s10 + $0x18] sm:$0xff]  ;;  %s1875_s22 = smov (!%p436_p10, %s1296_s22), 7 }
  0x19   : > { %v948_v29 = vld [vmem:[%s1860_s10 + $0x10] sm:$0xff]  ;;  %v1096_v30 = vld [vmem:[%s1861_s11 + $0x8] sm:$0xff]  ;;  %v1095_v31 = vld [vmem:[%s1861_s11] sm:$0xff]  ;;  %s438_s25 = scalar_lea.vmem %s1869_s0, %s1875_s22  ;;  %s432_s22 = sand.u32 1, %s1422_s28  }
  0x1a   : > { %509 = vperm.xlu1 %1367, %v499_v6   ;;  %v1097_v32 = vld [vmem:[%s1861_s11 + $0x10] sm:$0xff]  ;;  %v950_v33 = vld [vmem:[%s1860_s10 + $0x20] sm:$0xff]  ;;  %v1098_v34 = vld [vmem:[%s1861_s11 + $0x18] sm:$0xff]  ;;  %s1295_s23 = sshll.u32 %s432_s22, 1  ;;  %s1221_s17 = scalar_lea.sflag [#allocation4], %s432_s22 }
  0x1b   : > { %452 = vperm.xlu0 %1366, %v444_v5   ;;  %v951_v35 = vld [vmem:[%s1860_s10 + $0x28] sm:$0xff]  ;;  %v1099_v36 = vld [vmem:[%s1861_s11 + $0x20] sm:$0xff]  ;;  %v952_v37 = vld [vmem:[%s1860_s10 + $0x30] sm:$0xff] }
  0x1c   : > { %v1100_v38 = vld [vmem:[%s1861_s11 + $0x28] sm:$0xff]  ;;  %v953_v39 = vld [vmem:[%s1860_s10 + $0x38] sm:$0xff]  ;;  %v1101_v41 = vld [vmem:[%s1861_s11 + $0x30] sm:$0xff] }
  0x1d   : > { %v1102_v40 = vld [vmem:[%s1861_s11 + $0x38] sm:$0xff]  ;;  %v1185_v42 = vld [vmem:[#allocation2] sm:$0x1]  ;;  %v491_v4 = vld [vmem:[%s1853_s3 + $0x8] sm:$0xff] }
  0x1e   : > { %519 = vperm.xlu1 %1367, %v501_v8   ;;  %v442_v47 = vld [vmem:[%s438_s25] sm:$0x3]  ;;  %v492_v8 = vld [vmem:[%s1853_s3 + $0x10] sm:$0xff]  ;;  %s434_s25 = scalar_lea.vmem [#allocation3], %s1295_s23  ;;  %s1372_s23 = sshll.u32 %s1434_s12, 4  ;;  %s1373_s23 = int_to_ptr.vmem [resolvable:$false] %s1372_s23 }
  0x1f   : > { %504 = vperm.xlu0 %1366, %v498_v7   ;;  %v459_v48 = vrot.slane %v442_v47, %v458_v45  ;;  %v463_v49 = vrot.slane %v442_v47, %v462_v46  ;;  %v490_v2 = vld [vmem:[%s1853_s3] sm:$0xff]  ;;  %v591_v46 = vld [vmem:[%s1855_s5 + $0x8] sm:$0xff]  ;;  %s1235_s26 = sshll.u32 %s434_s25, 4  ;;  %s1374_s0 = scalar_lea.vmem %s1373_s23, 64  ;;  %s1810_s26 = int_to_ptr.vmem [resolvable:$true] %s1235_s26 }
  0x20   : > { %v494_v7 = vpack.c.bf16 %v491_v4, %v490_v2  ;;  %s1368_s21 = scalar_lea.vmem %s1810_s26, 32  ;;  %p1375_p0 = scmp.lt.s32.totalorder %s1810_s26, %s1373_s23 }
  0x21   : > { %p1369_p11 = scmp.ne.s32.totalorder %s1810_s26, %s1368_s21  ;;  %p1376_p1 = scmp.lt.s32.totalorder %s1374_s0, %s1368_s21 }
  0x22   : > { %621 = vperm.xlu1 %1367, %v607_v10  }
  0x23   : > { %514 = vperm.xlu0 %1366, %v500_v9   ;;  %v493_v9 = vld [vmem:[%s1853_s3 + $0x18] sm:$0xff]  ;;  %p1370_p12 = pnand %p1369_p11, %p1546_p5  ;;  %p1377_p2 = por %p1376_p1, %p1375_p0 }
  0x24   : > { %v495_v10 = vpack.c.bf16 %v493_v9, %v492_v8 }
  0x25   : > { %p1371_p13 = pneg %p1370_p12 }
  0x26   : > { %631 = vperm.xlu1 %1367, %v609_v12  }
  0x27   : > { %616 = vperm.xlu0 %1366, %v606_v11   ;;  %p1378_p3 = pnand %p1377_p2, %p1371_p13 }
  0x2a   : > { %641 = vperm.xlu1 %1367, %v611_v14  }
  0x2b   : > { %626 = vperm.xlu0 %1366, %v608_v13  }
  0x2e   : > { %651 = vperm.xlu1 %1367, %v613_v16  }
  0x2f   : > { %636 = vperm.xlu0 %1366, %v610_v15  }
  0x32   : > { %791 = vperm.xlu1 %1367, %v777_v18  }
  0x33   : > { %646 = vperm.xlu0 %1366, %v612_v17  }
  0x36   : > { %801 = vperm.xlu1 %1367, %v779_v20  }
  0x37   : > { %786 = vperm.xlu0 %1366, %v776_v19  }
  0x3a   : > { %811 = vperm.xlu1 %1367, %v781_v22  }
  0x3b   : > { %796 = vperm.xlu0 %1366, %v778_v21  }
  0x3e   : > { %821 = vperm.xlu1 %1367, %v783_v24  }
  0x3f   : > { %806 = vperm.xlu0 %1366, %v780_v23  }
  0x42   : > { %961 = vperm.xlu1 %1367, %v947_v26  }
  0x43   : > { %816 = vperm.xlu0 %1366, %v782_v25  }
  0x46   : > { %971 = vperm.xlu1 %1367, %v949_v28  }
  0x47   : > { %956 = vperm.xlu0 %1366, %v946_v27  }
  0x4a   : > { %1110 = vperm.xlu1 %1367, %v1096_v30  }
  0x4b   : > { %966 = vperm.xlu0 %1366, %v948_v29  }
  0x4e   : > { %1115 = vperm.xlu1 %1367, %v1097_v32  }
  0x4f   : > { %1105 = vperm.xlu0 %1366, %v1095_v31  }
  0x52   : > { %1120 = vperm.xlu1 %1367, %v1098_v34  }
  0x53   : > { %976 = vperm.xlu0 %1366, %v950_v33  }
  0x56   : > { %1125 = vperm.xlu1 %1367, %v1099_v36  }
  0x57   : > { %981 = vperm.xlu0 %1366, %v951_v35  }
  0x5a   : > { %1130 = vperm.xlu1 %1367, %v1100_v38  }
  0x5b   : > { %986 = vperm.xlu0 %1366, %v952_v37  }
  0x5e   : > { %1140 = vperm.xlu1 %1367, %v1102_v40  }
  0x5f   : > { %991 = vperm.xlu0 %1366, %v953_v39  }
  0x63   : > { %1135 = vperm.xlu0 %1366, %v1101_v41  }
  0x67   : > { %1188 = vperm.xlu0 %1366, %v1185_v42   ;;  %v590_v42 = vld [vmem:[%s1855_s5] sm:$0xff] }
  0x91   : > { %v475_v50 = vpop.permute.xlu1 %474 }
  0x95   : > { %v480_v59 = vpop.permute.xlu1 %479 }
  0x96   : > { %v448_v51 = vpop.permute.xlu0 %447 }
  0x97   : > { %v466_v52 = vmul.f32 %v459_v48, %v448_v51  ;;  %v467_v53 = vmul.f32 %v463_v49, %v448_v51 }
  0x99   : > { %v482_v55 = vadd.f32 %v475_v50, %v466_v52  ;;  %v483_v58 = vadd.f32 %v475_v50, %v467_v53  ;;  %v510_v15 = vpop.permute.xlu1 %509  ;;  %v593_v50 = vld [vmem:[%s1855_s5 + $0x18] sm:$0xff]  ;;  %v594_v52 = vld [vmem:[%s1855_s5 + $0x20] sm:$0xff]  ;;  %v595_v53 = vld [vmem:[%s1855_s5 + $0x28] sm:$0xff] }
  0x9a   : > { %v453_v54 = vpop.permute.xlu0 %452 }
  0x9b   : > { %v468_v56 = vmul.f32 %v459_v48, %v453_v54  ;;  %v469_v57 = vmul.f32 %v463_v49, %v453_v54  ;;  %v487_v62 = vmax.f32 %v483_v58, 0.0  ;;  %v486_v0 = vmax.f32 %v482_v55, 0.0  ;;  %v592_v49 = vld [vmem:[%s1855_s5 + $0x10] sm:$0xff] }
  0x9c   : > { %v598_v48 = vpack.c.bf16 %v591_v46, %v590_v42  ;;  %v599_v51 = vpack.c.bf16 %v593_v50, %v592_v49  ;;  %v600_v54 = vpack.c.bf16 %v595_v53, %v594_v52  ;;  %v596_v55 = vld [vmem:[%s1855_s5 + $0x30] sm:$0xff] }
  0x9d   : > { %v484_v60 = vadd.f32 %v480_v59, %v468_v56  ;;  %v485_v61 = vadd.f32 %v480_v59, %v469_v57  ;;  %v520_v31 = vpop.permute.xlu1 %519  ;;  %v597_v56 = vld [vmem:[%s1855_s5 + $0x38] sm:$0xff] }
  0x9e   : > { %v505_v11 = vpop.permute.xlu0 %504  ;;  %v601_v57 = vpack.c.bf16 %v597_v56, %v596_v55 }
  0x9f   : > { %v489_v63 = vmax.f32 %v485_v61, 0.0  ;;  %v488_v1 = vmax.f32 %v484_v60, 0.0 }
  0xa1   : > { %v497_v5 = vpack.c.bf16 %v489_v63, %v487_v62  ;;  %v496_v6 = vpack.c.bf16 %v488_v1, %v486_v0  ;;  %v622_v62 = vpop.permute.xlu1 %621 }
  0xa2   : > { %v515_v26 = vpop.permute.xlu0 %514 }
  0xa3   : > { %529 = vmatprep.subr.bf16.mxu0 %v497_v5 }
  0xa4   : > { %530 = vmatpush1.bf16.msra.mxu0 %v496_v6 }
  0xa6   : > { %v617_v58 = vpop.permute.xlu0 %616 }
  0xa7   : > { %1297 = vmatmul.mubr.msk.bf16.vlgmr.msra.gmra.mrb[0].mxu0 %vm522_vm0, %v494_v7 }
  0xa8   : > { %571 = vmatprep.mubr.bf16.mxu0 %v1432_v3 }
  0xaf   : > { %1298 = vmatmul.mubr.msk.bf16.gmra.mrb[4].mxu0 %vm522_vm0, %v495_v10  ;;  %v627_v10 = vpop.permute.xlu0 %626 }
  0xb0   : > { %869 = vmatprep.mubr.bf16.mxu0 %v1432_v3 }
 0x17a   : > { %v563_v12 = vpop.f32.mrb[0].mxu0 }
 0x17b   : > { %v564_v13 = vadd.f32 %v563_v12, %v505_v11  ;;  %v565_v14 = vpop.f32.mrb[1].mxu0 }
 0x17c   : > { %v566_v16 = vadd.f32 %v565_v14, %v505_v11  ;;  %v567_v17 = vpop.f32.mrb[2].mxu0 }
 0x17d   : > { %v568_v18 = vadd.f32 %v567_v17, %v510_v15  ;;  %v569_v19 = vpop.f32.mrb[3].mxu0  ;;  %v582_v21 = vmax.f32 %v564_v13, 0.0 }
 0x17e   : > { %v570_v20 = vadd.f32 %v569_v19, %v510_v15  ;;  %v583_v23 = vmax.f32 %v566_v16, 0.0  ;;  %v632_v15 = vpop.permute.xlu1 %631 }
 0x17f   : > { %v584_v22 = vmax.f32 %v568_v18, 0.0 }
 0x180   : > { %v585_v24 = vmax.f32 %v570_v20, 0.0 }
 0x181   : > { %v602_v25 = vpack.c.bf16 %v584_v22, %v582_v21 }
 0x182   : > { %v573_v27 = vpop.f32.mrb[4].mxu0  ;;  %v603_v28 = vpack.c.bf16 %v585_v24, %v583_v23 }
 0x183   : > { %v574_v29 = vadd.f32 %v573_v27, %v515_v26  ;;  %v575_v30 = vpop.f32.mrb[5].mxu0 }
 0x184   : > { %v576_v32 = vadd.f32 %v575_v30, %v515_v26  ;;  %v577_v33 = vpop.f32.mrb[6].mxu0  ;;  %667 = vmatprep.subr.bf16.mxu1 %v603_v28  ;;  %v637_v26 = vpop.permute.xlu0 %636 }
 0x185   : > { %v578_v34 = vadd.f32 %v577_v33, %v520_v31  ;;  %v579_v35 = vpop.f32.mrb[7].mxu0  ;;  %668 = vmatpush1.bf16.msra.mxu1 %v602_v25  ;;  %v586_v37 = vmax.f32 %v574_v29, 0.0 }
 0x186   : > { %v580_v36 = vadd.f32 %v579_v35, %v520_v31  ;;  %v587_v39 = vmax.f32 %v576_v32, 0.0  ;;  %v642_v31 = vpop.permute.xlu1 %641 }
 0x187   : > { %v588_v38 = vmax.f32 %v578_v34, 0.0 }
 0x188   : > { %v589_v40 = vmax.f32 %v580_v36, 0.0  ;;  %v647_v42 = vpop.permute.xlu0 %646 }
 0x189   : > { %v604_v41 = vpack.c.bf16 %v588_v38, %v586_v37 }
 0x18a   : > { %v605_v47 = vpack.c.bf16 %v589_v40, %v587_v39  ;;  %v652_v50 = vpop.permute.xlu1 %651 }
 0x18c   : > { %669 = vmatprep.subr.bf16.mxu1 %v605_v47 }
 0x18d   : > { %670 = vmatpush1.bf16.msra.mxu1 %v604_v41 }
 0x190   : > { %1299 = vmatmul.mubr.msk.bf16.vlgmr.msra.gmra.mrb[0].mxu1 %vm654_vm1, %v598_v48 }
 0x191   : > { %709 = vmatprep.mubr.bf16.mxu1 %v1432_v3 }
 0x198   : > { %1300 = vmatmul.mubr.msk.bf16.gmra.mrb[4].mxu1 %vm654_vm1, %v599_v51 }
 0x199   : > { %719 = vmatprep.mubr.bf16.mxu1 %v1432_v3 }
 0x1a0   : > { %1301 = vmatmul.mubr.msk.bf16.gmra.mrb[8].mxu1 %vm654_vm1, %v600_v54 }
 0x1a1   : > { %729 = vmatprep.mubr.bf16.mxu1 %v1432_v3 }
 0x1a8   : > { %1302 = vmatmul.mubr.msk.bf16.gmra.mrb[12].mxu1 %vm654_vm1, %v601_v57 }
 0x1a9   : > { %1048 = vmatprep.mubr.bf16.mxu1 %v1432_v3 }
 0x263   : > { %v701_v59 = vpop.f32.mrb[0].mxu1 }
 0x264   : > { %v702_v60 = vadd.f32 %v701_v59, %v617_v58  ;;  %v703_v61 = vpop.f32.mrb[1].mxu1 }
 0x265   : > { %v704_v63 = vadd.f32 %v703_v61, %v617_v58  ;;  %v705_v0 = vpop.f32.mrb[2].mxu1  ;;  %v756_v61 = vld [vmem:[%s1857_s7] sm:$0xff] }
 0x266   : > { %v706_v1 = vadd.f32 %v705_v0, %v622_v62  ;;  %v707_v2 = vpop.f32.mrb[3].mxu1  ;;  %v740_v5 = vmax.f32 %v702_v60, 0.0 }
 0x267   : > { %v708_v4 = vadd.f32 %v707_v2, %v622_v62  ;;  %v741_v7 = vmax.f32 %v704_v63, 0.0  ;;  %v757_v62 = vld [vmem:[%s1857_s7 + $0x8] sm:$0xff]  ;;  %v759_v2 = vld [vmem:[%s1857_s7 + $0x18] sm:$0xff] }
 0x268   : > { %v742_v6 = vmax.f32 %v706_v1, 0.0  ;;  %v764_v0 = vpack.c.bf16 %v757_v62, %v756_v61  ;;  %v758_v1 = vld [vmem:[%s1857_s7 + $0x10] sm:$0xff] }
 0x269   : > { %v743_v8 = vmax.f32 %v708_v4, 0.0  ;;  %v765_v4 = vpack.c.bf16 %v759_v2, %v758_v1 }
 0x26a   : > { %v768_v9 = vpack.c.bf16 %v742_v6, %v740_v5  ;;  %v760_v5 = vld [vmem:[%s1857_s7 + $0x20] sm:$0xff]  ;;  %v761_v6 = vld [vmem:[%s1857_s7 + $0x28] sm:$0xff] }
 0x26b   : > { %v769_v11 = vpack.c.bf16 %v743_v8, %v741_v7  ;;  %v711_v12 = vpop.f32.mrb[4].mxu1  ;;  %v766_v7 = vpack.c.bf16 %v761_v6, %v760_v5  ;;  %v762_v8 = vld [vmem:[%s1857_s7 + $0x30] sm:$0xff] }
 0x26c   : > { %v712_v13 = vadd.f32 %v711_v12, %v627_v10  ;;  %v713_v14 = vpop.f32.mrb[5].mxu1 }
 0x26d   : > { %v714_v16 = vadd.f32 %v713_v14, %v627_v10  ;;  %v715_v17 = vpop.f32.mrb[6].mxu1  ;;  %837 = vmatprep.subr.bf16.mxu0 %v769_v11  ;;  %v787_v11 = vpop.permute.xlu0 %786 }
 0x26e   : > { %v716_v18 = vadd.f32 %v715_v17, %v632_v15  ;;  %v717_v19 = vpop.f32.mrb[7].mxu1  ;;  %838 = vmatpush1.bf16.msra.mxu0 %v768_v9  ;;  %v744_v21 = vmax.f32 %v712_v13, 0.0  ;;  %v763_v9 = vld [vmem:[%s1857_s7 + $0x38] sm:$0xff] }
 0x26f   : > { %v718_v20 = vadd.f32 %v717_v19, %v632_v15  ;;  %v745_v23 = vmax.f32 %v714_v16, 0.0  ;;  %v767_v10 = vpack.c.bf16 %v763_v9, %v762_v8  ;;  %v792_v15 = vpop.permute.xlu1 %791 }
 0x270   : > { %v746_v22 = vmax.f32 %v716_v18, 0.0 }
 0x271   : > { %v747_v24 = vmax.f32 %v718_v20, 0.0 }
 0x272   : > { %v770_v25 = vpack.c.bf16 %v746_v22, %v744_v21 }
 0x273   : > { %v771_v27 = vpack.c.bf16 %v747_v24, %v745_v23  ;;  %v721_v28 = vpop.f32.mrb[8].mxu1 }
 0x274   : > { %v722_v29 = vadd.f32 %v721_v28, %v637_v26  ;;  %v723_v30 = vpop.f32.mrb[9].mxu1 }
 0x275   : > { %v724_v32 = vadd.f32 %v723_v30, %v637_v26  ;;  %v725_v33 = vpop.f32.mrb[10].mxu1  ;;  %839 = vmatprep.subr.bf16.mxu0 %v771_v27  ;;  %v797_v26 = vpop.permute.xlu0 %796 }
 0x276   : > { %v726_v34 = vadd.f32 %v725_v33, %v642_v31  ;;  %v727_v35 = vpop.f32.mrb[11].mxu1  ;;  %840 = vmatpush1.bf16.msra.mxu0 %v770_v25  ;;  %v748_v37 = vmax.f32 %v722_v29, 0.0 }
 0x277   : > { %v728_v36 = vadd.f32 %v727_v35, %v642_v31  ;;  %v749_v39 = vmax.f32 %v724_v32, 0.0  ;;  %v802_v31 = vpop.permute.xlu1 %801 }
 0x278   : > { %v750_v38 = vmax.f32 %v726_v34, 0.0 }
 0x279   : > { %v751_v40 = vmax.f32 %v728_v36, 0.0 }
 0x27a   : > { %v772_v41 = vpack.c.bf16 %v750_v38, %v748_v37 }
 0x27b   : > { %v773_v46 = vpack.c.bf16 %v751_v40, %v749_v39  ;;  %v731_v47 = vpop.f32.mrb[12].mxu1 }
 0x27c   : > { %v732_v48 = vadd.f32 %v731_v47, %v647_v42  ;;  %v733_v49 = vpop.f32.mrb[13].mxu1 }
 0x27d   : > { %v734_v51 = vadd.f32 %v733_v49, %v647_v42  ;;  %v735_v52 = vpop.f32.mrb[14].mxu1  ;;  %841 = vmatprep.subr.bf16.mxu0 %v773_v46  ;;  %v807_v42 = vpop.permute.xlu0 %806 }
 0x27e   : > { %v736_v53 = vadd.f32 %v735_v52, %v652_v50  ;;  %v737_v54 = vpop.f32.mrb[15].mxu1  ;;  %842 = vmatpush1.bf16.msra.mxu0 %v772_v41  ;;  %v752_v56 = vmax.f32 %v732_v48, 0.0 }
 0x27f   : > { %v738_v55 = vadd.f32 %v737_v54, %v652_v50  ;;  %v753_v58 = vmax.f32 %v734_v51, 0.0  ;;  %v812_v50 = vpop.permute.xlu1 %811 }
 0x280   : > { %v754_v57 = vmax.f32 %v736_v53, 0.0 }
 0x281   : > { %v755_v59 = vmax.f32 %v738_v55, 0.0  ;;  %v817_v61 = vpop.permute.xlu0 %816 }
 0x282   : > { %v774_v60 = vpack.c.bf16 %v754_v57, %v752_v56 }
 0x283   : > { %v775_v63 = vpack.c.bf16 %v755_v59, %v753_v58  ;;  %v822_v2 = vpop.permute.xlu1 %821 }
 0x285   : > { %843 = vmatprep.subr.bf16.mxu0 %v775_v63 }
 0x286   : > { %844 = vmatpush1.bf16.msra.mxu0 %v774_v60 }
 0x289   : > { %1303 = vmatmul.mubr.msk.bf16.vlgmr.msra.gmra.mrb[8].mxu0 %vm824_vm2, %v764_v0 }
 0x28a   : > { %879 = vmatprep.mubr.bf16.mxu0 %v1432_v3 }
 0x291   : > { %1304 = vmatmul.mubr.msk.bf16.gmra.mrb[12].mxu0 %vm824_vm2, %v765_v4 }
 0x292   : > { %889 = vmatprep.mubr.bf16.mxu0 %v1432_v3 }
 0x299   : > { %1305 = vmatmul.mubr.msk.bf16.gmra.mrb[16].mxu0 %vm824_vm2, %v766_v7 }
 0x29a   : > { %899 = vmatprep.mubr.bf16.mxu0 %v1432_v3 }
 0x2a1   : > { %1306 = vmatmul.mubr.msk.bf16.gmra.mrb[20].mxu0 %vm824_vm2, %v767_v10 }
 0x2a2   : > { %1038 = vmatprep.mubr.bf16.mxu0 %v1432_v3 }
 0x35c   : > { %v871_v12 = vpop.f32.mrb[8].mxu0 }
 0x35d   : > { %v872_v13 = vadd.f32 %v871_v12, %v787_v11  ;;  %v873_v14 = vpop.f32.mrb[9].mxu0 }
 0x35e   : > { %v874_v16 = vadd.f32 %v873_v14, %v787_v11  ;;  %v875_v17 = vpop.f32.mrb[10].mxu0 }
 0x35f   : > { %v876_v18 = vadd.f32 %v875_v17, %v792_v15  ;;  %v877_v19 = vpop.f32.mrb[11].mxu0  ;;  %v910_v21 = vmax.f32 %v872_v13, 0.0  ;;  %v926_v13 = vld [vmem:[%s1859_s9] sm:$0xff]  ;;  %v929_v17 = vld [vmem:[%s1859_s9 + $0x18] sm:$0xff] }
 0x360   : > { %v878_v20 = vadd.f32 %v877_v19, %v792_v15  ;;  %v911_v23 = vmax.f32 %v874_v16, 0.0  ;;  %v927_v15 = vld [vmem:[%s1859_s9 + $0x8] sm:$0xff]  ;;  %v928_v16 = vld [vmem:[%s1859_s9 + $0x10] sm:$0xff] }
 0x361   : > { %v912_v22 = vmax.f32 %v876_v18, 0.0  ;;  %v934_v19 = vpack.c.bf16 %v927_v15, %v926_v13 }
 0x362   : > { %v913_v24 = vmax.f32 %v878_v20, 0.0  ;;  %v935_v20 = vpack.c.bf16 %v929_v17, %v928_v16 }
 0x363   : > { %v938_v25 = vpack.c.bf16 %v912_v22, %v910_v21  ;;  %v930_v21 = vld [vmem:[%s1859_s9 + $0x20] sm:$0xff]  ;;  %v931_v22 = vld [vmem:[%s1859_s9 + $0x28] sm:$0xff] }
 0x364   : > { %v939_v27 = vpack.c.bf16 %v913_v24, %v911_v23  ;;  %v881_v28 = vpop.f32.mrb[12].mxu0  ;;  %v936_v23 = vpack.c.bf16 %v931_v22, %v930_v21  ;;  %v932_v24 = vld [vmem:[%s1859_s9 + $0x30] sm:$0xff] }
 0x365   : > { %v882_v29 = vadd.f32 %v881_v28, %v797_v26  ;;  %v883_v30 = vpop.f32.mrb[13].mxu0  ;;  %v957_v28 = vpop.permute.xlu0 %956 }
 0x366   : > { %v884_v32 = vadd.f32 %v883_v30, %v797_v26  ;;  %v885_v33 = vpop.f32.mrb[14].mxu0  ;;  %1006 = vmatprep.subr.bf16.mxu0 %v939_v27  ;;  %1317 = vmatprep.subr.bf16.mxu1 %v939_v27  ;;  %v962_v27 = vpop.permute.xlu1 %961 }
 0x367   : > { %v886_v34 = vadd.f32 %v885_v33, %v802_v31  ;;  %v887_v35 = vpop.f32.mrb[15].mxu0  ;;  %1007 = vmatpush1.bf16.msra.mxu0 %v938_v25  ;;  %1321 = vmatpush1.bf16.msra.mxu1 %v938_v25  ;;  %v914_v37 = vmax.f32 %v882_v29, 0.0  ;;  %v933_v25 = vld [vmem:[%s1859_s9 + $0x38] sm:$0xff] }
 0x368   : > { %v888_v36 = vadd.f32 %v887_v35, %v802_v31  ;;  %v915_v39 = vmax.f32 %v884_v32, 0.0  ;;  %v937_v26 = vpack.c.bf16 %v933_v25, %v932_v24 }
 0x369   : > { %v916_v38 = vmax.f32 %v886_v34, 0.0  ;;  %v967_v30 = vpop.permute.xlu0 %966 }
 0x36a   : > { %v917_v40 = vmax.f32 %v888_v36, 0.0  ;;  %v972_v29 = vpop.permute.xlu1 %971 }
 0x36b   : > { %v940_v41 = vpack.c.bf16 %v916_v38, %v914_v37 }
 0x36c   : > { %v941_v46 = vpack.c.bf16 %v917_v40, %v915_v39  ;;  %v891_v47 = vpop.f32.mrb[16].mxu0 }
 0x36d   : > { %v892_v48 = vadd.f32 %v891_v47, %v807_v42  ;;  %v893_v49 = vpop.f32.mrb[17].mxu0  ;;  %v1106_v32 = vpop.permute.xlu0 %1105 }
 0x36e   : > { %v894_v51 = vadd.f32 %v893_v49, %v807_v42  ;;  %v895_v52 = vpop.f32.mrb[18].mxu0  ;;  %1008 = vmatprep.subr.bf16.mxu0 %v941_v46  ;;  %1318 = vmatprep.subr.bf16.mxu1 %v941_v46  ;;  %v1111_v31 = vpop.permute.xlu1 %1110 }
 0x36f   : > { %v896_v53 = vadd.f32 %v895_v52, %v812_v50  ;;  %v897_v54 = vpop.f32.mrb[19].mxu0  ;;  %1009 = vmatpush1.bf16.msra.mxu0 %v940_v41  ;;  %1322 = vmatpush1.bf16.msra.mxu1 %v940_v41  ;;  %v918_v56 = vmax.f32 %v892_v48, 0.0 }
 0x370   : > { %v898_v55 = vadd.f32 %v897_v54, %v812_v50  ;;  %v919_v58 = vmax.f32 %v894_v51, 0.0 }
 0x371   : > { %v920_v57 = vmax.f32 %v896_v53, 0.0  ;;  %v977_v34 = vpop.permute.xlu0 %976 }
 0x372   : > { %v921_v59 = vmax.f32 %v898_v55, 0.0  ;;  %v1116_v33 = vpop.permute.xlu1 %1115 }
 0x373   : > { %v942_v60 = vpack.c.bf16 %v920_v57, %v918_v56 }
 0x374   : > { %v943_v62 = vpack.c.bf16 %v921_v59, %v919_v58  ;;  %v901_v63 = vpop.f32.mrb[20].mxu0 }
 0x375   : > { %v902_v0 = vadd.f32 %v901_v63, %v817_v61  ;;  %v903_v1 = vpop.f32.mrb[21].mxu0  ;;  %v982_v35 = vpop.permute.xlu0 %981 }
 0x376   : > { %v904_v4 = vadd.f32 %v903_v1, %v817_v61  ;;  %v905_v5 = vpop.f32.mrb[22].mxu0  ;;  %1010 = vmatprep.subr.bf16.mxu0 %v943_v62  ;;  %1319 = vmatprep.subr.bf16.mxu1 %v943_v62 }
 0x377   : > { %v906_v6 = vadd.f32 %v905_v5, %v822_v2  ;;  %v907_v7 = vpop.f32.mrb[23].mxu0  ;;  %1011 = vmatpush1.bf16.msra.mxu0 %v942_v60  ;;  %1323 = vmatpush1.bf16.msra.mxu1 %v942_v60  ;;  %v922_v9 = vmax.f32 %v902_v0, 0.0 }
 0x378   : > { %v908_v8 = vadd.f32 %v907_v7, %v822_v2  ;;  %v923_v11 = vmax.f32 %v904_v4, 0.0 }
 0x379   : > { %v924_v10 = vmax.f32 %v906_v6, 0.0  ;;  %v987_v1 = vpop.permute.xlu0 %986 }
 0x37a   : > { %v925_v12 = vmax.f32 %v908_v8, 0.0 }
 0x37b   : > { %v944_v14 = vpack.c.bf16 %v924_v10, %v922_v9 }
 0x37c   : > { %v945_v18 = vpack.c.bf16 %v925_v12, %v923_v11 }
 0x37e   : > { %1012 = vmatprep.subr.bf16.mxu0 %v945_v18  ;;  %1320 = vmatprep.subr.bf16.mxu1 %v945_v18 }
 0x37f   : > { %1013 = vmatpush1.bf16.msra.mxu0 %v944_v14  ;;  %1324 = vmatpush1.bf16.msra.mxu1 %v944_v14 }
 0x382   : > { %1307 = vmatmul.mubr.msk.bf16.vlgmr.msra.gmra.mrb[24].mxu0 %vm824_vm2, %v934_v19  ;;  %1308 = vmatmul.mubr.msk.bf16.vlgmr.msra.gmra.mrb[16].mxu1 %vm824_vm2, %v935_v20 }
 0x383   : > { %1058 = vmatprep.mubr.bf16.mxu1 %v1432_v3 }
 0x38a   : > { %1309 = vmatmul.mubr.msk.bf16.gmra.mrb[20].mxu1 %vm824_vm2, %v936_v23 }
 0x38b   : > { %1068 = vmatprep.mubr.bf16.mxu1 %v1432_v3  ;;  %v1121_v3 = vpop.permute.xlu1 %1120 }
 0x38f   : > { %v1126_v61 = vpop.permute.xlu1 %1125 }
 0x392   : > { %1310 = vmatmul.mubr.msk.bf16.gmra.mrb[24].mxu1 %vm824_vm2, %v937_v26 }
 0x455   : > { %v1040_v36 = vpop.f32.mrb[24].mxu0  ;;  %v1050_v37 = vpop.f32.mrb[16].mxu1 }
 0x456   : > { %v1041_v38 = vadd.f32 %v1040_v36, %v957_v28  ;;  %v1051_v39 = vadd.f32 %v1050_v37, %v967_v30  ;;  %v1042_v40 = vpop.f32.mrb[25].mxu0  ;;  %v1052_v41 = vpop.f32.mrb[17].mxu1 }
 0x457   : > { %v1043_v42 = vadd.f32 %v1042_v40, %v957_v28  ;;  %v1053_v46 = vadd.f32 %v1052_v41, %v967_v30  ;;  %v1044_v47 = vpop.f32.mrb[26].mxu0  ;;  %v1054_v48 = vpop.f32.mrb[18].mxu1 }
 0x458   : > { %v1079_v49 = vmax.f32 %v1041_v38, 0.0  ;;  %v1045_v50 = vadd.f32 %v1044_v47, %v962_v27  ;;  %v1055_v51 = vadd.f32 %v1054_v48, %v972_v29  ;;  %v1046_v52 = vpop.f32.mrb[27].mxu0  ;;  %v1056_v53 = vpop.f32.mrb[19].mxu1  ;;  %v1083_v57 = vmax.f32 %v1051_v39, 0.0 }
 0x459   : > { %v1080_v54 = vmax.f32 %v1043_v42, 0.0  ;;  %v1047_v55 = vadd.f32 %v1046_v52, %v962_v27  ;;  %v1057_v56 = vadd.f32 %v1056_v53, %v972_v29  ;;  %v1084_v59 = vmax.f32 %v1053_v46, 0.0  ;;  %v1131_v27 = vpop.permute.xlu1 %1130  ;;  %v992_v28 = vpop.permute.xlu0 %991 }
 0x45a   : > { %v1081_v58 = vmax.f32 %v1045_v50, 0.0  ;;  %v1143_v62 = vmul.f32 %v1106_v32, %v1079_v49  ;;  %v1085_v0 = vmax.f32 %v1055_v51, 0.0  ;;  %v1147_v7 = vmul.f32 %v1116_v33, %v1083_v57 }
 0x45b   : > { %v1082_v60 = vmax.f32 %v1047_v55, 0.0  ;;  %v1144_v2 = vmul.f32 %v1106_v32, %v1080_v54  ;;  %v1086_v5 = vmax.f32 %v1057_v56, 0.0  ;;  %v1148_v11 = vmul.f32 %v1116_v33, %v1084_v59 }
 0x45c   : > { %v1145_v63 = vmul.f32 %v1111_v31, %v1081_v58  ;;  %v1149_v15 = vmul.f32 %v1121_v3, %v1085_v0 }
 0x45d   : > { %v1146_v4 = vmul.f32 %v1111_v31, %v1082_v60  ;;  %v1060_v6 = vpop.f32.mrb[20].mxu1  ;;  %v1150_v20 = vmul.f32 %v1121_v3, %v1086_v5  ;;  %v1136_v48 = vpop.permute.xlu0 %1135  ;;  %v1433_v5 = vmov 1966171168  }
 0x45e   : > { %v1159_v8 = vadd.f32 %v1145_v63, %v1143_v62  ;;  %v1061_v9 = vadd.f32 %v1060_v6, %v977_v34  ;;  %v1062_v10 = vpop.f32.mrb[21].mxu1  ;;  %v1141_v53 = vpop.permute.xlu1 %1140  ;;  %v1201_v6 = vunpack.c.l.s4 %v1433_v5 }
 0x45f   : > { %v1172_v12 = vadd.f32 %v1146_v4, %v1144_v2  ;;  %v1063_v13 = vadd.f32 %v1062_v10, %v977_v34  ;;  %v1064_v14 = vpop.f32.mrb[22].mxu1 }
 0x460   : > { %v1160_v16 = vadd.f32 %v1159_v8, %v1147_v7  ;;  %v1087_v17 = vmax.f32 %v1061_v9, 0.0  ;;  %v1065_v18 = vadd.f32 %v1064_v14, %v982_v35  ;;  %v1066_v19 = vpop.f32.mrb[23].mxu1 }
 0x461   : > { %v1173_v21 = vadd.f32 %v1172_v12, %v1148_v11  ;;  %v1088_v22 = vmax.f32 %v1063_v13, 0.0  ;;  %v1067_v23 = vadd.f32 %v1066_v19, %v982_v35  ;;  %v1189_v8 = vpop.permute.xlu0 %1188  ;;  %v1202_v12 = vunpack.c.0.s8 %v1201_v6 }
 0x462   : > { %v1161_v24 = vadd.f32 %v1160_v16, %v1149_v15  ;;  %v1151_v25 = vmul.f32 %v1126_v61, %v1087_v17  ;;  %v1089_v26 = vmax.f32 %v1065_v18, 0.0  ;;  %v1194_v13 = vrot.slane %v1189_v8, %v458_v45 }
 0x463   : > { %v1174_v29 = vadd.f32 %v1173_v21, %v1150_v20  ;;  %v1152_v30 = vmul.f32 %v1126_v61, %v1088_v22  ;;  %v1090_v31 = vmax.f32 %v1067_v23, 0.0  ;;  %v1205_v18 = vsub.s32 %v1202_v12, %v1682_v44 }
 0x464   : > { %v1162_v32 = vadd.f32 %v1161_v24, %v1151_v25  ;;  %v1153_v33 = vmul.f32 %v1131_v27, %v1089_v26 }
 0x465   : > { %v1175_v34 = vadd.f32 %v1174_v29, %v1152_v30  ;;  %v1154_v36 = vmul.f32 %v1131_v27, %v1090_v31  ;;  %v1070_v37 = vpop.f32.mrb[24].mxu1 }
 0x466   : > { %v1163_v38 = vadd.f32 %v1162_v32, %v1153_v33  ;;  %v1071_v39 = vadd.f32 %v1070_v37, %v987_v1  ;;  %v1072_v40 = vpop.f32.mrb[25].mxu1 }
 0x467   : > { %v1176_v3 = vadd.f32 %v1175_v34, %v1154_v36  ;;  %v1073_v41 = vadd.f32 %v1072_v40, %v987_v1  ;;  %v1074_v42 = vpop.f32.mrb[26].mxu1 }
 0x468   : > { %v1091_v35 = vmax.f32 %v1071_v39, 0.0  ;;  %v1075_v46 = vadd.f32 %v1074_v42, %v992_v28  ;;  %v1076_v47 = vpop.f32.mrb[27].mxu1 }
 0x469   : > { %v1092_v49 = vmax.f32 %v1073_v41, 0.0  ;;  %v1077_v50 = vadd.f32 %v1076_v47, %v992_v28 }
 0x46a   : > { %v1155_v51 = vmul.f32 %v1136_v48, %v1091_v35  ;;  %v1093_v52 = vmax.f32 %v1075_v46, 0.0 }
 0x46b   : > { %v1156_v54 = vmul.f32 %v1136_v48, %v1092_v49  ;;  %v1094_v55 = vmax.f32 %v1077_v50, 0.0 }
 0x46c   : > { %v1164_v56 = vadd.f32 %v1163_v38, %v1155_v51  ;;  %v1157_v57 = vmul.f32 %v1141_v53, %v1093_v52 }
 0x46d   : > { %v1177_v58 = vadd.f32 %v1176_v3, %v1156_v54  ;;  %v1158_v59 = vmul.f32 %v1141_v53, %v1094_v55 }
 0x46e   : > { %v1165_v60 = vadd.f32 %v1164_v56, %v1157_v57 }
 0x46f   : > { %v1178_v61 = vadd.f32 %v1177_v58, %v1158_v59 }
 0x470   : > { %v1166_v62 = vrot.slane %v1165_v60, 4 }
 0x471   : > { %v1179_v63 = vrot.slane %v1178_v61, 4 }
 0x472   : > { %v1167_v0 = vadd.f32 %v1166_v62, %v1165_v60 }
 0x473   : > { %v1180_v1 = vadd.f32 %v1179_v63, %v1178_v61 }
 0x474   : > { %v1168_v2 = vrot.slane %v1167_v0, 2 }
 0x475   : > { %v1181_v4 = vrot.slane %v1180_v1, 2 }
 0x476   : > { %v1169_v7 = vadd.f32 %v1168_v2, %v1167_v0 }
 0x477   : > { %v1182_v9 = vadd.f32 %v1181_v4, %v1180_v1 }
 0x478   : > { %v1170_v10 = vrot.slane %v1169_v7, 1 }
 0x479   : > { %v1183_v11 = vrot.slane %v1182_v9, 1 }
 0x47a   : > { %v1171_v14 = vadd.f32 %v1170_v10, %v1169_v7 }
 0x47b   : > { %v1184_v15 = vadd.f32 %v1183_v11, %v1182_v9 }
 0x47c   : > { %v1195_v16 = vadd.f32 %v1194_v13, %v1171_v14 }
 0x47d   : > { %v1196_v17 = vadd.f32 %v1194_v13, %v1184_v15 }
 0x47f   : > { %v1199_v19 = vcombine.low %v1195_v16, %v1196_v17 }
 0x481   : > { %v1206_v20 = vrot.slane %v1199_v19, %v1205_v18 }
 0x483   : > { %v1213_v21 = vrot.slane %v1206_v20, %v1205_v18 }
 0x485   : > { %1219 = vst.msk [vmem:[%s434_s25] sm:$0x3] %vm1217_vm3, %v1213_v21 }
 0x486   : > { %1381 = shalt.err (!%p1378_p3)
}
 0x487   : > { %s1382_s22 = scalar_lea.hbm %s1808_s16, 32  ;;  %s1386_s14 = scalar_lea.hbm %s1863_s13, 128 }
 0x488   : > { %p1383_p4 = scmp.ne.s32.totalorder %s1808_s16, %s1382_s22  ;;  %p1387_p9 = scmp.lt.u32.totalorder %s1808_s16, %s1863_s13 }
 0x489   : > { %p1388_p10 = scmp.lt.u32.totalorder %s1386_s14, %s1382_s22  ;;  %p1390_p12 = scmp.lt.u32.totalorder %s1382_s22, %s1808_s16 }
 0x48a   : > { %p1384_p7 = pnand %p1383_p4, %p1546_p5 }
 0x48b   : > { %p1389_p11 = por %p1388_p10, %p1387_p9 }
 0x48c   : > { %p1385_p8 = pneg %p1384_p7 }
 0x48d   : > { %p1391_p13 = por %p1390_p12, %p1389_p11 }
 0x48f   : > { %p1392_p0 = pnand %p1391_p13, %p1385_p8 }
 0x491   : > { %1395 = shalt.err (!%p1392_p0)
}
 0x492   : > { %1325 = dma.vmem_to_hbm [thread:$0]  (%p1546_p5), %s1810_s26, 32, %s1808_s16, %s1221_s17  }
 0x493 PF: > { %p1331_p1 = scmp.ge.s32.totalorder %s1430_s30, 2  ;;  %s1247_s0 = sand.u32 1, %s1418_s27  }
 0x494   : > { %s1248_s21 = scalar_lea.sflag [#allocation4], %s1247_s0 }
 0x495   : > { %p1328_p2 = pnand %p1331_p1, %p1550_p6 }
 0x497   : > { %1413 = dma.done.wait (!%p1328_p2), %s1248_s21, 32  }
 0x498   : > { %1415 = vsyncadd (!%p1328_p2), %s1248_s21, 4294967264  ;;  %p25_p3 = scmp.ge.s32.totalorder %s1533_s15, 6   ;;  %s1870_s27 = smov %s1422_s28 }
 0x499   : > { %s1871_s28 = smov %s1426_s29  ;;  %s1872_s29 = smov %s1544_s18 }
 0x49a   : > { %s1873_s30 = smov %s1533_s15  ;;  %27 = sbr.rel (!%p25_p3) target bundleno = 6 (0x6), region = 107 }
 0x4a1   :  { %1253 = vsyncpa [#allocation4], 1 }
 0x4a2   :  { %1255 = vsyncpa [#allocation4 + $0x1], 1 }

</bundles_post_ra>
